<compile_context>
chip_gen: v7x
topology: tpu7x:2x2x1
jax: 0.10.0
libtpu: 0.0.40
codegen_flags: <defaults>
</compile_context>

<pallas_src>
import functools

import jax
import jax.numpy as jnp
from jax.experimental import pallas as pl
from jax.experimental.pallas import tpu as pltpu


_NEG_FILL = -1e30  # vocab-edge fill; exp(fill - max) underflows to 0.


def _round_up(x, m):
    return (x + m - 1) // m * m


def _cdiv(a, b):
    return (a + b - 1) // b


def _token_ce_kernel(logits_ref, tgt_ref, out_ref, m_sc, l_sc, t_sc, *,
                     pad_idx, tile_v, vocab):
    """One (token-tile, vocab-chunk) step of online-logsumexp cross entropy.

    `vocab` is the true vocab size V when V % tile_v != 0 (edge masking
    needed), otherwise None (no mask code is emitted at all).
    """
    v = pl.program_id(1)
    num_v = pl.num_programs(1)

    # Reset per-token running stats at the first vocab chunk of each tile.
    @pl.when(v == 0)
    def _():
        m_sc[...] = jnp.full_like(m_sc, -jnp.inf)
        l_sc[...] = jnp.zeros_like(l_sc)
        t_sc[...] = jnp.zeros_like(t_sc)

    raw = logits_ref[...]                                   # (TM, TV) native dtype
    tgt = tgt_ref[...]                                      # (TM, 1) int32

    # Chunk-local column index (no global offset added to the full tile).
    lane = jax.lax.broadcasted_iota(jnp.int32, raw.shape, 1)

    # Mask columns past V (only on edge chunks; non-edge chunks get an
    # all-true compare).  Applied BEFORE max / exp / gather so garbage from
    # the unpadded HBM read cannot leak into the logsumexp.
    if vocab is not None:
        rem = vocab - v * tile_v                            # scalar valid-col count
        raw = jnp.where(lane < rem, raw, jnp.array(_NEG_FILL, dtype=raw.dtype))

    # Chunk max and target-logit gather in the native dtype (bf16 on the wire
    # stays bf16 through the VPU-heavy passes on v6e/v7x).
    chunk_max = jnp.max(raw, axis=-1, keepdims=True).astype(jnp.float32)
    local_tgt = tgt - v * tile_v                            # (TM, 1) cheap subtract
    onehot = lane == local_tgt
    gathered = jnp.sum(jnp.where(onehot, raw, jnp.array(0, dtype=raw.dtype)),
                       axis=-1, keepdims=True)              # exact: <=1 nonzero/row
    t_sc[...] += gathered.astype(jnp.float32)

    # Online logsumexp update (f32 only where needed: the exp/sum path).
    m_prev = m_sc[...]
    m_new = jnp.maximum(m_prev, chunk_max)
    x32 = raw.astype(jnp.float32)
    l_sc[...] = l_sc[...] * jnp.exp(m_prev - m_new) + jnp.sum(
        jnp.exp(x32 - m_new), axis=-1, keepdims=True)
    m_sc[...] = m_new

    # Last vocab chunk: finish per-token losses, mask pads (this also masks
    # the target-padded overrun rows of the last token tile), reduce once and
    # emit a lane-dense partial block for this token tile.
    @pl.when(v == num_v - 1)
    def _():
        lse = m_sc[...] + jnp.log(l_sc[...])                # (TM, 1)
        per_token = lse - t_sc[...]                         # (TM, 1)
        not_pad = tgt != pad_idx
        tile_sum = jnp.sum(jnp.where(not_pad, per_token, 0.0))
        sub = jax.lax.broadcasted_iota(jnp.int32, out_ref.shape, 1)
        lane_o = jax.lax.broadcasted_iota(jnp.int32, out_ref.shape, 2)
        out_ref[...] = jnp.where((sub == 0) & (lane_o == 0), tile_sum,
                                 jnp.float32(0.0))


def token_cross_entropy_loss(logits, targets, pad_idx=0, tile_m=None,
                             tile_v=None):
    """logits: [..., V] float (f32/bf16); targets: [...] int.

    Returns (loss_sum, count) == (sum of CE over non-pad tokens,
                                  number of non-pad tokens).
    """
    V = logits.shape[-1]
    x = logits.reshape(-1, V)                 # no copy, no padding of logits
    t = targets.reshape(-1).astype(jnp.int32)
    N = x.shape[0]

    # Count is trivially cheap in XLA; keep it out of the kernel entirely.
    count = jnp.sum((t != pad_idx).astype(jnp.int32))

    itemsize = jnp.dtype(x.dtype).itemsize

    # --- tile selection -----------------------------------------------------
    # Vocab chunk: up to 8192 lanes (or full V rounded to 128 when smaller).
    if tile_v is None:
        tile_v = min(8192, _round_up(V, 128))
    tile_v = min(_round_up(int(tile_v), 128), _round_up(V, 128))

    # Token tile: up to 512 rows, but keep a single logits block <= ~8 MiB
    # (double-buffered <= 16 MiB, well inside v7x's 64 MiB VMEM).
    if tile_m is None:
        max_rows = max(16, (8 << 20) // (tile_v * itemsize))
        tile_m = min(512, max_rows)
    tile_m = _round_up(int(tile_m), 16)
    tile_m = min(tile_m, _round_up(N, 16))
    # v7x dual-TC: keep at least 2 token tiles whenever N allows it, so the
    # "parallel" axis actually splits across both TensorCores.
    if N > 16:
        tile_m = min(tile_m, _round_up(_cdiv(N, 2), 16))
    tile_m = max(tile_m, 16)

    num_m = _cdiv(N, tile_m)
    num_v = _cdiv(V, tile_v)

    # Pad ONLY the tiny int32 target vector (rows past N get pad_idx and are
    # masked in-kernel); the big logits tensor is read in place.
    n_rows = num_m * tile_m
    if n_rows != N:
        t = jnp.pad(t, (0, n_rows - N), constant_values=pad_idx)
    t = t.reshape(n_rows, 1)

    kernel = functools.partial(
        _token_ce_kernel, pad_idx=pad_idx, tile_v=tile_v,
        vocab=V if (V % tile_v) != 0 else None)

    # VMEM budget: double-buffered logits dominates; (TM,1) refs pad lanes
    # to 128.  Cap at 56 MiB so it is always v7x-safe (64 MiB physical/TC).
    vmem_need = (2 * tile_m * tile_v * itemsize   # logits, double-buffered
                 + 2 * tile_m * 128 * 4           # targets (lane-padded)
                 + 2 * 8 * 128 * 4                # lane-dense partial output
                 + 3 * tile_m * 128 * 4)          # scratch (lane-padded)
    vmem_limit = int(min(max(32 << 20, int(1.5 * vmem_need) + (8 << 20)),
                         56 << 20))

    partials = pl.pallas_call(
        kernel,
        out_shape=jax.ShapeDtypeStruct((num_m, 8, 128), jnp.float32),
        grid_spec=pltpu.PrefetchScalarGridSpec(
            num_scalar_prefetch=0,
            grid=(num_m, num_v),
            in_specs=[
                pl.BlockSpec((tile_m, tile_v), lambda m, v: (m, v)),
                pl.BlockSpec((tile_m, 1), lambda m, v: (m, 0)),
            ],
            out_specs=pl.BlockSpec((1, 8, 128), lambda m, v: (m, 0, 0)),
            scratch_shapes=[
                pltpu.VMEM((tile_m, 1), jnp.float32),  # running max
                pltpu.VMEM((tile_m, 1), jnp.float32),  # running exp-sum
                pltpu.VMEM((tile_m, 1), jnp.float32),  # target logit
            ],
        ),
        compiler_params=pltpu.CompilerParams(
            dimension_semantics=("parallel", "arbitrary"),
            vmem_limit_bytes=vmem_limit,
        ),
    )(x, t)

    loss_sum = jnp.sum(partials)
    return loss_sum, count


def _reference(logits, targets, pad_idx=0):
    V = logits.shape[-1]
    lf = logits.reshape(-1, V).astype(jnp.float32)
    tf = targets.reshape(-1)
    logp = jax.nn.log_softmax(lf, axis=-1)
    nll = -jnp.take_along_axis(logp, tf[:, None], axis=-1)[:, 0]
    mask = tf != pad_idx
    return jnp.sum(jnp.where(mask, nll, 0.0)), jnp.sum(mask.astype(jnp.int32))


if __name__ == "__main__":
    key = jax.random.PRNGKey(0)
    k1, k2, k3, k4, k5, k6 = jax.random.split(key, 6)
    pad_idx = 0

    # Test 1: small f32 case (single tile on both axes; vocab-edge mask path
    # since V=32 < 128).
    batch, seq, vocab = 2, 8, 32
    logits = jax.random.normal(k1, (batch, seq, vocab), dtype=jnp.float32)
    targets = jax.random.randint(k2, (batch, seq), 0, vocab, dtype=jnp.int32)
    targets = targets.at[:, -2:].set(pad_idx)   # exercise ignore_index path

    loss_sum, count = token_cross_entropy_loss(logits, targets, pad_idx=pad_idx)
    jax.block_until_ready((loss_sum, count))
    ref_loss, ref_count = _reference(logits, targets, pad_idx=pad_idx)
    assert jnp.allclose(loss_sum, ref_loss, rtol=1e-5, atol=1e-4), (loss_sum, ref_loss)
    assert int(count) == int(ref_count), (count, ref_count)

    # Test 2: bf16 logits, non-divisible N and V, multiple token and vocab
    # tiles (exercises unpadded-logits edge masking, bf16 max/gather path,
    # target row padding).
    batch2, seq2, vocab2 = 3, 48, 300
    logits2 = jax.random.normal(k3, (batch2, seq2, vocab2), dtype=jnp.bfloat16)
    targets2 = jax.random.randint(k4, (batch2, seq2), 0, vocab2, dtype=jnp.int32)
    targets2 = targets2.at[:, -5:].set(pad_idx)

    loss2, count2 = token_cross_entropy_loss(
        logits2, targets2, pad_idx=pad_idx, tile_m=64, tile_v=128)
    jax.block_until_ready((loss2, count2))
    ref_loss2, ref_count2 = _reference(logits2, targets2, pad_idx=pad_idx)
    assert jnp.allclose(loss2, ref_loss2, rtol=1e-4, atol=1e-2), (loss2, ref_loss2)
    assert int(count2) == int(ref_count2), (count2, ref_count2)

    # Test 3: f32, default tile selection (num_m >= 2 split, single big vocab
    # chunk with edge mask, non-divisible N).
    batch3, seq3, vocab3 = 4, 37, 1000
    logits3 = jax.random.normal(k5, (batch3, seq3, vocab3), dtype=jnp.float32)
    targets3 = jax.random.randint(k6, (batch3, seq3), 0, vocab3, dtype=jnp.int32)
    targets3 = targets3.at[:, :3].set(pad_idx)

    loss3, count3 = token_cross_entropy_loss(logits3, targets3, pad_idx=pad_idx)
    jax.block_until_ready((loss3, count3))
    ref_loss3, ref_count3 = _reference(logits3, targets3, pad_idx=pad_idx)
    assert jnp.allclose(loss3, ref_loss3, rtol=1e-5, atol=1e-3), (loss3, ref_loss3)
    assert int(count3) == int(ref_count3), (count3, ref_count3)

    # TODO(synk): PyTorch returns `count` via .item() (host int); here it stays
    # a device scalar to avoid a forced host sync.
    print("KERNEL_OK")
</pallas_src>

<mosaic_0001>
module attributes {stable_mosaic.version = 11 : i64} {
  func.func @_token_ce_kernel(%arg0: i32, %arg1: i32, %arg2: memref<16x128xf32, #tpu.memory_space<vmem>>, %arg3: memref<16x1xi32, #tpu.memory_space<vmem>>, %arg4: memref<1x8x128xf32, #tpu.memory_space<vmem>>, %arg5: memref<16x1xf32, #tpu.memory_space<vmem>>, %arg6: memref<16x1xf32, #tpu.memory_space<vmem>>, %arg7: memref<16x1xf32, #tpu.memory_space<vmem>>) attributes {dimension_semantics = [#tpu.dimension_semantics<parallel>, #tpu.dimension_semantics<arbitrary>], iteration_bounds = array<i64: 1, 1>, scalar_prefetch = 0 : i64, scratch_operands = 3 : i64, tpu.core_type = #tpu.core_type<tc>, window_params = [{transform_indices = @transform_0, window_bounds = array<i64: 16, 128>}, {transform_indices = @transform_1, window_bounds = array<i64: 16, 1>}, {transform_indices = @transform_2, window_bounds = array<i64: 1, 8, 128>}]} {
    %c0_i32 = arith.constant 0 : i32
    %0 = arith.cmpi eq, %arg1, %c0_i32 : i32
    %1 = arith.extui %0 : i1 to i32
    %c0_i32_0 = arith.constant 0 : i32
    %2 = arith.cmpi ne, %1, %c0_i32_0 : i32
    scf.if %2 {
      %cst_23 = arith.constant 0xFF800000 : f32
      %43 = vector.broadcast %cst_23 : f32 to vector<16x1xf32>
      %c0_24 = arith.constant 0 : index
      %c0_25 = arith.constant 0 : index
      %44 = vector.load %arg5[%c0_24, %c0_25] : memref<16x1xf32, #tpu.memory_space<vmem>>, vector<16x1xf32>
      tpu.vector_store %arg5[%c0_24, %c0_25], %43 {strides = array<i32>} : memref<16x1xf32, #tpu.memory_space<vmem>>, vector<16x1xf32>,
      %cst_26 = arith.constant 0.000000e+00 : f32
      %45 = vector.broadcast %cst_26 : f32 to vector<16x1xf32>
      %c0_27 = arith.constant 0 : index
      %c0_28 = arith.constant 0 : index
      %46 = vector.load %arg6[%c0_27, %c0_28] : memref<16x1xf32, #tpu.memory_space<vmem>>, vector<16x1xf32>
      tpu.vector_store %arg6[%c0_27, %c0_28], %45 {strides = array<i32>} : memref<16x1xf32, #tpu.memory_space<vmem>>, vector<16x1xf32>,
      %cst_29 = arith.constant 0.000000e+00 : f32
      %47 = vector.broadcast %cst_29 : f32 to vector<16x1xf32>
      %c0_30 = arith.constant 0 : index
      %c0_31 = arith.constant 0 : index
      %48 = vector.load %arg7[%c0_30, %c0_31] : memref<16x1xf32, #tpu.memory_space<vmem>>, vector<16x1xf32>
      tpu.vector_store %arg7[%c0_30, %c0_31], %47 {strides = array<i32>} : memref<16x1xf32, #tpu.memory_space<vmem>>, vector<16x1xf32>,
    } else {
    }
    %c0 = arith.constant 0 : index
    %c0_1 = arith.constant 0 : index
    %3 = vector.load %arg2[%c0, %c0_1] : memref<16x128xf32, #tpu.memory_space<vmem>>, vector<16x128xf32>
    %c0_2 = arith.constant 0 : index
    %c0_3 = arith.constant 0 : index
    %4 = vector.load %arg3[%c0_2, %c0_3] : memref<16x1xi32, #tpu.memory_space<vmem>>, vector<16x1xi32>
    %5 = tpu.iota {dimensions = array<i32: 1>} : vector<16x128xi32>
    %c128_i32 = arith.constant 128 : i32
    %6 = arith.muli %arg1, %c128_i32 : i32
    %c32_i32 = arith.constant 32 : i32
    %7 = arith.subi %c32_i32, %6 : i32
    %8 = vector.broadcast %7 : i32 to vector<16x128xi32>
    %9 = arith.cmpi slt, %5, %8 : vector<16x128xi32>
    %cst = arith.constant -1.000000e+30 : f32
    %10 = vector.broadcast %cst : f32 to vector<16x128xf32>
    %11 = arith.select %9, %3, %10 : vector<16x128xi1>, vector<16x128xf32>
    %cst_4 = arith.constant dense<0xFF800000> : vector<16xf32>
    %12 = vector.multi_reduction <maximumf>, %11, %cst_4 [1] : vector<16x128xf32> to vector<16xf32>
    %13 = vector.shape_cast %12 : vector<16xf32> to vector<16x1xf32>
    %c128_i32_5 = arith.constant 128 : i32
    %14 = arith.muli %arg1, %c128_i32_5 : i32
    %15 = vector.broadcast %14 : i32 to vector<16x1xi32>
    %16 = arith.subi %4, %15 : vector<16x1xi32>
    %17 = vector.broadcast %16 : vector<16x1xi32> to vector<16x128xi32>
    %18 = arith.cmpi eq, %5, %17 : vector<16x128xi32>
    %cst_6 = arith.constant 0.000000e+00 : f32
    %19 = vector.broadcast %cst_6 : f32 to vector<16x128xf32>
    %20 = arith.select %18, %11, %19 : vector<16x128xi1>, vector<16x128xf32>
    %cst_7 = arith.constant dense<0.000000e+00> : vector<16xf32>
    %21 = vector.multi_reduction <add>, %20, %cst_7 [1] : vector<16x128xf32> to vector<16xf32>
    %22 = vector.shape_cast %21 : vector<16xf32> to vector<16x1xf32>
    %c0_8 = arith.constant 0 : index
    %c0_9 = arith.constant 0 : index
    %23 = vector.load %arg7[%c0_8, %c0_9] : memref<16x1xf32, #tpu.memory_space<vmem>>, vector<16x1xf32>
    %24 = arith.addf %23, %22 : vector<16x1xf32>
    %c0_10 = arith.constant 0 : index
    %c0_11 = arith.constant 0 : index
    %25 = vector.load %arg7[%c0_10, %c0_11] : memref<16x1xf32, #tpu.memory_space<vmem>>, vector<16x1xf32>
    tpu.vector_store %arg7[%c0_10, %c0_11], %24 {strides = array<i32>} : memref<16x1xf32, #tpu.memory_space<vmem>>, vector<16x1xf32>,
    %c0_12 = arith.constant 0 : index
    %c0_13 = arith.constant 0 : index
    %26 = vector.load %arg5[%c0_12, %c0_13] : memref<16x1xf32, #tpu.memory_space<vmem>>, vector<16x1xf32>
    %27 = arith.maximumf %26, %13 : vector<16x1xf32>
    %c0_14 = arith.constant 0 : index
    %c0_15 = arith.constant 0 : index
    %28 = vector.load %arg6[%c0_14, %c0_15] : memref<16x1xf32, #tpu.memory_space<vmem>>, vector<16x1xf32>
    %29 = arith.subf %26, %27 : vector<16x1xf32>
    %30 = math.exp %29 : vector<16x1xf32>
    %31 = arith.mulf %28, %30 : vector<16x1xf32>
    %32 = vector.broadcast %27 : vector<16x1xf32> to vector<16x128xf32>
    %33 = arith.subf %11, %32 : vector<16x128xf32>
    %34 = math.exp %33 : vector<16x128xf32>
    %cst_16 = arith.constant dense<0.000000e+00> : vector<16xf32>
    %35 = vector.multi_reduction <add>, %34, %cst_16 [1] : vector<16x128xf32> to vector<16xf32>
    %36 = vector.shape_cast %35 : vector<16xf32> to vector<16x1xf32>
    %37 = arith.addf %31, %36 : vector<16x1xf32>
    %c0_17 = arith.constant 0 : index
    %c0_18 = arith.constant 0 : index
    %38 = vector.load %arg6[%c0_17, %c0_18] : memref<16x1xf32, #tpu.memory_space<vmem>>, vector<16x1xf32>
    tpu.vector_store %arg6[%c0_17, %c0_18], %37 {strides = array<i32>} : memref<16x1xf32, #tpu.memory_space<vmem>>, vector<16x1xf32>,
    %c0_19 = arith.constant 0 : index
    %c0_20 = arith.constant 0 : index
    %39 = vector.load %arg5[%c0_19, %c0_20] : memref<16x1xf32, #tpu.memory_space<vmem>>, vector<16x1xf32>
    tpu.vector_store %arg5[%c0_19, %c0_20], %27 {strides = array<i32>} : memref<16x1xf32, #tpu.memory_space<vmem>>, vector<16x1xf32>,
    %c0_i32_21 = arith.constant 0 : i32
    %40 = arith.cmpi eq, %arg1, %c0_i32_21 : i32
    %41 = arith.extui %40 : i1 to i32
    %c0_i32_22 = arith.constant 0 : i32
    %42 = arith.cmpi ne, %41, %c0_i32_22 : i32
    scf.if %42 {
      %c0_23 = arith.constant 0 : index
      %c0_24 = arith.constant 0 : index
      %43 = vector.load %arg5[%c0_23, %c0_24] : memref<16x1xf32, #tpu.memory_space<vmem>>, vector<16x1xf32>
      %c0_25 = arith.constant 0 : index
      %c0_26 = arith.constant 0 : index
      %44 = vector.load %arg6[%c0_25, %c0_26] : memref<16x1xf32, #tpu.memory_space<vmem>>, vector<16x1xf32>
      %45 = math.log %44 : vector<16x1xf32>
      %46 = arith.addf %43, %45 : vector<16x1xf32>
      %c0_27 = arith.constant 0 : index
      %c0_28 = arith.constant 0 : index
      %47 = vector.load %arg7[%c0_27, %c0_28] : memref<16x1xf32, #tpu.memory_space<vmem>>, vector<16x1xf32>
      %48 = arith.subf %46, %47 : vector<16x1xf32>
      %c0_i32_29 = arith.constant 0 : i32
      %49 = vector.broadcast %c0_i32_29 : i32 to vector<16x1xi32>
      %50 = arith.cmpi ne, %4, %49 : vector<16x1xi32>
      %cst_30 = arith.constant 0.000000e+00 : f32
      %51 = vector.broadcast %cst_30 : f32 to vector<16x1xf32>
      %52 = arith.select %50, %48, %51 : vector<16x1xi1>, vector<16x1xf32>
      %53 = vector.shape_cast %52 : vector<16x1xf32> to vector<1x16x1xf32>
      %cst_31 = arith.constant dense<0.000000e+00> : vector<1xf32>
      %54 = vector.multi_reduction <add>, %53, %cst_31 [1, 2] : vector<1x16x1xf32> to vector<1xf32>
      %55 = vector.shape_cast %54 : vector<1xf32> to vector<1x1x1xf32>
      %56 = vector.extract %55[0, 0, 0] : f32 from vector<1x1x1xf32>
      %57 = tpu.iota {dimensions = array<i32: 1>} : vector<1x8x128xi32>
      %58 = tpu.iota {dimensions = array<i32: 2>} : vector<1x8x128xi32>
      %c0_i32_32 = arith.constant 0 : i32
      %59 = vector.broadcast %c0_i32_32 : i32 to vector<1x8x128xi32>
      %60 = arith.cmpi eq, %57, %59 : vector<1x8x128xi32>
      %c0_i32_33 = arith.constant 0 : i32
      %61 = vector.broadcast %c0_i32_33 : i32 to vector<1x8x128xi32>
      %62 = arith.cmpi eq, %58, %61 : vector<1x8x128xi32>
      %63 = arith.andi %60, %62 : vector<1x8x128xi1>
      %cst_34 = arith.constant 0.000000e+00 : f32
      %64 = vector.broadcast %56 : f32 to vector<1x8x128xf32>
      %65 = vector.broadcast %cst_34 : f32 to vector<1x8x128xf32>
      %66 = arith.select %63, %64, %65 : vector<1x8x128xi1>, vector<1x8x128xf32>
      %c0_35 = arith.constant 0 : index
      %c0_36 = arith.constant 0 : index
      %c0_37 = arith.constant 0 : index
      %67 = vector.load %arg4[%c0_35, %c0_36, %c0_37] : memref<1x8x128xf32, #tpu.memory_space<vmem>>, vector<1x8x128xf32>
      tpu.vector_store %arg4[%c0_35, %c0_36, %c0_37], %66 {strides = array<i32>} : memref<1x8x128xf32, #tpu.memory_space<vmem>>, vector<1x8x128xf32>,
    } else {
    }
    return
  }
  func.func @transform_0(%arg0: i32, %arg1: i32) -> (i32, i32) {
    %c0_i32 = arith.constant 0 : i32
    return %arg0, %arg1 : i32, i32
  }
  func.func @transform_1(%arg0: i32, %arg1: i32) -> (i32, i32) {
    %c0_i32 = arith.constant 0 : i32
    %c0_i32_0 = arith.constant 0 : i32
    return %arg0, %c0_i32 : i32, i32
  }
  func.func @transform_2(%arg0: i32, %arg1: i32) -> (i32, i32, i32) {
    %c0_i32 = arith.constant 0 : i32
    %c0_i32_0 = arith.constant 0 : i32
    %c0_i32_1 = arith.constant 0 : i32
    return %arg0, %c0_i32, %c0_i32_0 : i32, i32, i32
  }
}

</mosaic_0001>

<bundles_post_ra>
// kernel: tpu_custom_call.1
= control target key start
LH: loop header
LB: loop body
LE: loop exit
PB: predicated region body
PF: predicated region fallthrough
CT: control target
= control target key end

     0   :  { %v27_v0 = vlaneseq  ;;  %s275_s0 = inlined_call_operand.vmem [shape: f32[16,32], index: 0, kind: input, shape index: {}]   ;;  %s276_s1 = inlined_call_operand.vmem [shape: s32[16,1], index: 1, kind: input, shape index: {}]   ;;  %s277_s2 = inlined_call_operand.hbm [shape: f32[1,8,128], index: 2, kind: output, shape index: {}]  }
   0x1   :  { %7 = vsyncpa [#allocation6], 0  ;;  %v23_v1 = vld [vmem:[%s275_s0] sm:$0xff]  ;;  %v24_v3 = vld [vmem:[%s275_s0 + $0x8] sm:$0xff]  ;;  %vm16_vm1 = vcmask 7168   ;;  %v202_v6 = vmov -inf  }
   0x2   :  { %v225_v2 = vand.u32 127, %v27_v0  ;;  %17 = vst.msk [vmem:[#allocation2] sm:$0xff] %vm16_vm1, %v202_v6  ;;  %18 = vst.msk [vmem:[#allocation2 + $0x8] sm:$0xff] %vm16_vm1, %v202_v6  ;;  %v203_v7 = vmov 0   ;;  %v204_v8 = vmov 0.0   ;;  %v240_v9 = vld [vmem:[%s276_s1] sm:$0xff] }
   0x3   :  { %164 = vset.pattern.permute.xlu1 %v203_v7  ;;  %165 = vset.pattern.permute.xlu0 %v203_v7  ;;  %19 = vst.msk [vmem:[#allocation3] sm:$0xff] %vm16_vm1, %v204_v8  ;;  %20 = vst.msk [vmem:[#allocation3 + $0x8] sm:$0xff] %vm16_vm1, %v204_v8  ;;  %v248_v18 = vld [vmem:[%s276_s1 + $0x8] sm:$0xff]  ;;  %vm120_vm4 = vcmp.ne.s32.totalorder %v240_v9, 0  ;;  %s205_s1 = smov [#allocation5]  }
   0x4   :  { %vm32_vm0 = vcmp.lt.s32.totalorder %v225_v2, 32  ;;  %21 = vst.msk [vmem:[#allocation4] sm:$0xff] %vm16_vm1, %v204_v8  ;;  %22 = vst.msk [vmem:[#allocation4 + $0x8] sm:$0xff] %vm16_vm1, %v204_v8  ;;  %vm121_vm5 = vcmp.ne.s32.totalorder %v248_v18, 0  ;;  %vm139_vm7 = vcmp.eq.s32.totalorder %v225_v2, 0  ;;  %s150_s16 = sshll.u32 %s205_s1, 4  ;;  %s151_s16 = int_to_ptr.vmem [resolvable:$true] %s150_s16 }
   0x5   :  { %v33_v4 = vsel %vm32_vm0, %v23_v1, -1e+30  ;;  %v34_v5 = vsel %vm32_vm0, %v24_v3, -1e+30  ;;  %s178_s18 = scalar_lea.vmem %s151_s16, 128  ;;  %p183_p1 = scmp.lt.s32.totalorder %s151_s16, %s151_s16 }
   0x6   :  { %35 = vmax.xlane.f32.xlu0 %v33_v4  ;;  %p179_p0 = scmp.ne.s32.totalorder %s151_s16, %s178_s18  ;;  %p184_p2 = scmp.lt.s32.totalorder %s178_s18, %s178_s18 }
   0x8   :  { %p185_p3 = por %p184_p2, %p183_p1 }
   0x9   :  { %v63_v10 = vld [vmem:[#allocation2] sm:$0xff]  ;;  %v64_v13 = vld [vmem:[#allocation2 + $0x8] sm:$0xff] }
   0xa   :  { %37 = vmax.xlane.f32.xlu0 %v34_v5  ;;  %v67_v37 = vld [vmem:[#allocation3] sm:$0xff]  ;;  %v68_v41 = vld [vmem:[#allocation3 + $0x8] sm:$0xff]  ;;  %p186_p4 = pnand %p185_p3, %p179_p0 }
   0xb   :  { %v56_v32 = vld [vmem:[#allocation4] sm:$0xff]  ;;  %v57_v46 = vld [vmem:[#allocation4 + $0x8] sm:$0xff] }
  0x20   :  { %43 = vperm.xlu0 %165, %v240_v9  }
  0x93   :  { %v36_v11 = vpop.xlane.xlu0 %35 }
  0x94   :  { %v65_v12 = vmax.f32 %v63_v10, %v36_v11 }
  0x96   :  { %v69_v14 = vsub.f32 %v63_v10, %v65_v12  ;;  %101 = vst.msk [vmem:[#allocation2] sm:$0xff] %vm16_vm1, %v65_v12  ;;  %79 = vperm.xlu1 %164, %v65_v12  }
  0x97   :  { %v38_v15 = vpop.xlane.xlu0 %37 }
  0x98   :  { %v66_v16 = vmax.f32 %v64_v13, %v38_v15  ;;  %v71_v34 = vmul.f32 1.442695, %v69_v14 }
  0x9a   :  { %v70_v17 = vsub.f32 %v64_v13, %v66_v16  ;;  %102 = vst.msk [vmem:[#allocation2 + $0x8] sm:$0xff] %vm16_vm1, %v66_v16  ;;  %84 = vperm.xlu1 %164, %v66_v16   ;;  %v137_v13 = vshrl.u32 %v27_v0, 7 }
  0x9c   :  { %v73_v35 = vmul.f32 1.442695, %v70_v17  ;;  %vm138_vm6 = vcmp.eq.s32.totalorder %v137_v13, 0 }
  0x9d   :  { %v106_v53 = vld [vmem:[#allocation2] sm:$0xff]  ;;  %vm140_vm8 = vmand %vm138_vm6, %vm139_vm7 }
  0x9e   :  { %46 = vperm.xlu1 %164, %v248_v18  }
  0x9f   :  { %v44_v19 = vpop.permute.xlu0 %43 }
  0xa0   :  { %vm48_vm2 = vcmp.eq.s32.totalorder %v225_v2, %v44_v19 }
  0xa1   :  { %v50_v20 = vsel %vm48_vm2, %v33_v4, 0.0  ;;  %v107_v59 = vld [vmem:[#allocation2 + $0x8] sm:$0xff] }
  0xa2   :  { %52 = vadd.xlane.f32.xlu0 %v50_v20 }
 0x115   :  { %v80_v21 = vpop.permute.xlu1 %79 }
 0x116   :  { %v87_v22 = vsub.f32 %v33_v4, %v80_v21 }
 0x118   :  { %v89_v23 = vmul.f32 1.442695, %v87_v22 }
 0x119   :  { %v85_v24 = vpop.permute.xlu1 %84 }
 0x11a   :  { %166 = vpow2.f32 %v89_v23  ;;  %v88_v25 = vsub.f32 %v34_v5, %v85_v24 }
 0x11c   :  { %v91_v26 = vmul.f32 1.442695, %v88_v25 }
 0x11d   :  { %v47_v28 = vpop.permute.xlu1 %46 }
 0x11e   :  { %168 = vpow2.f32 %v91_v26  ;;  %vm49_vm3 = vcmp.eq.s32.totalorder %v225_v2, %v47_v28 }
 0x11f   :  { %v51_v30 = vsel %vm49_vm3, %v34_v5, 0.0  ;;  %170 = vpow2.f32 %v71_v34 }
 0x120   :  { %172 = vpow2.f32 %v73_v35 }
 0x124   :  { %v167_v27 = vpop.eup %166 }
 0x125   :  { %93 = vadd.xlane.f32.xlu1 %v167_v27 }
 0x128   :  { %v169_v29 = vpop.eup %168 }
 0x129   :  { %95 = vadd.xlane.f32.xlu1 %v169_v29  ;;  %v171_v36 = vpop.eup %170 }
 0x12a   :  { %v75_v38 = vmul.f32 %v171_v36, %v67_v37  ;;  %v173_v39 = vpop.eup %172 }
 0x12b   :  { %v76_v43 = vmul.f32 %v173_v39, %v68_v41 }
 0x12d   :  { %54 = vadd.xlane.f32.xlu1 %v51_v30 }
 0x12f   :  { %v53_v31 = vpop.xlane.xlu0 %52 }
 0x130   :  { %v58_v33 = vadd.f32 %v56_v32, %v53_v31 }
 0x132   :  { %61 = vst.msk [vmem:[#allocation4] sm:$0xff] %vm16_vm1, %v58_v33 }
 0x139   :  { %v116_v54 = vld [vmem:[#allocation4] sm:$0xff] }
 0x1b2   :  { %v94_v40 = vpop.xlane.xlu1 %93 }
 0x1b3   :  { %v97_v42 = vadd.f32 %v94_v40, %v75_v38 }
 0x1b5   :  { %99 = vst.msk [vmem:[#allocation3] sm:$0xff] %vm16_vm1, %v97_v42 }
 0x1b6   :  { %v96_v44 = vpop.xlane.xlu1 %95 }
 0x1b7   :  { %v98_v45 = vadd.f32 %v96_v44, %v76_v43 }
 0x1b9   :  { %100 = vst.msk [vmem:[#allocation3 + $0x8] sm:$0xff] %vm16_vm1, %v98_v45 }
 0x1ba   :  { %v55_v47 = vpop.xlane.xlu1 %54 }
 0x1bb   :  { %v59_v48 = vadd.f32 %v57_v46, %v55_v47 }
 0x1bc   :  { %v108_v49 = vld [vmem:[#allocation3] sm:$0xff] }
 0x1bd   :  { %62 = vst.msk [vmem:[#allocation4 + $0x8] sm:$0xff] %vm16_vm1, %v59_v48  ;;  %174 = vlog2.f32 %v108_v49 }
 0x1c0   :  { %v109_v50 = vld [vmem:[#allocation3 + $0x8] sm:$0xff] }
 0x1c1   :  { %176 = vlog2.f32 %v109_v50 }
 0x1c4   :  { %v117_v61 = vld [vmem:[#allocation4 + $0x8] sm:$0xff] }
 0x1c7   :  { %v175_v51 = vpop.eup %174 }
 0x1c8   :  { %v111_v52 = vmul.f32 0.6931472, %v175_v51 }
 0x1ca   :  { %v114_v55 = vadd.f32 %v111_v52, %v106_v53 }
 0x1cb   :  { %v177_v56 = vpop.eup %176 }
 0x1cc   :  { %v113_v57 = vmul.f32 0.6931472, %v177_v56  ;;  %v118_v58 = vsub.f32 %v114_v55, %v116_v54 }
 0x1ce   :  { %v115_v60 = vadd.f32 %v113_v57, %v107_v59  ;;  %v122_v63 = vsel %vm120_vm4, %v118_v58, 0.0 }
 0x1cf   :  { %v124_v3 = vsel %vm16_vm1, %v122_v63, 0.0 }
 0x1d0   :  { %v119_v62 = vsub.f32 %v115_v60, %v117_v61 }
 0x1d2   :  { %v123_v1 = vsel %vm121_vm5, %v119_v62, 0.0 }
 0x1d3   :  { %v125_v4 = vsel %vm16_vm1, %v123_v1, 0.0 }
 0x1d4   :  { %v126_v5 = vadd.f32 %v125_v4, %v124_v3 }
 0x1d6   :  { %127 = vadd.xlane.f32.xlu1 %v126_v5 }
 0x263   :  { %v128_v6 = vpop.xlane.xlu1 %127 }
 0x264   :  { %v129_v7 = vrot.slane %v128_v6, 4 }
 0x266   :  { %v130_v8 = vadd.f32 %v129_v7, %v128_v6 }
 0x268   :  { %v131_v10 = vrot.slane %v130_v8, 2 }
 0x26a   :  { %v132_v11 = vadd.f32 %v131_v10, %v130_v8 }
 0x26c   :  { %v133_v9 = vrot.slane %v132_v11, 1 }
 0x26e   :  { %v134_v12 = vadd.f32 %v133_v9, %v132_v11 }
 0x270   :  { %158 = vpush %v134_v12 }
 0x2a1   :  { %s159_s17 = spop %158 }
 0x2a2   :  { %v141_v14 = vstv %s159_s17 }
 0x2a3   :  { %v142_v15 = vsel %vm140_vm8, %v141_v14, 0.0 }
 0x2a4   :  { %143 = vst [vmem:[#allocation5] sm:$0xff] %v142_v15 }
 0x2a5   :  { %189 = shalt.err (!%p186_p4)
}
 0x2a6   :  { %s190_s21 = scalar_lea.hbm %s277_s2, 128 }
 0x2a7   :  { %p191_p5 = scmp.ne.s32.totalorder %s277_s2, %s190_s21  ;;  %p194_p6 = scmp.lt.u32.totalorder %s190_s21, %s277_s2 }
 0x2a9   :  { %p196_p7 = pnand %p194_p6, %p191_p5 }
 0x2ab   :  { %199 = shalt.err (!%p196_p7)
}
 0x2ac   :  { %153 = dma.vmem_to_hbm [thread:$0]  %s151_s16, 128, %s277_s2, [#allocation6]  }
 0x2ad   :  { %200 = dma.done.wait [#allocation6], 128  }
 0x2ae   :  { %201 = vsyncadd [#allocation6], 4294967168 }
 0x2af   :  { %157 = vsyncpa [#allocation6], 1 }

</bundles_post_ra>
